<compile_context>
chip_gen: v5e
topology: v5e:2x2
jax: 0.10.0
libtpu: 0.0.40
codegen_flags: <defaults>
</compile_context>

<pallas_src>
import jax
import jax.numpy as jnp
from jax.experimental import pallas as pl
from jax.experimental.pallas import tpu as pltpu


def _round_up(x: int, m: int) -> int:
    return ((x + m - 1) // m) * m


def memory_gate_kernel(xn_ref, xv_ref, xs_ref, w1_ref, b1_ref, w2_ref, b2_ref,
                       o_ref):
    # Assemble the concatenated row block in VMEM (lane shuffles only; the
    # three HBM streams are never concatenated outside the kernel).
    x = jnp.concatenate([xn_ref[...], xv_ref[...], xs_ref[...]], axis=-1)

    # cat = x @ W1 + b1  (single K=D MXU pass, f32 accumulation).
    cat = jnp.dot(x, w1_ref[...], preferred_element_type=jnp.float32)
    cat = cat + b1_ref[...].astype(jnp.float32)

    # sigmoid(x) == 0.5 * tanh(0.5 * x) + 0.5 : one EUP transcendental.
    gate = 0.5 * jnp.tanh(0.5 * cat) + 0.5
    gated = gate * cat                  # f32, lane-dense (hidden padded to 128)

    fuse = jnp.dot(gated.astype(w2_ref.dtype), w2_ref[...],
                   preferred_element_type=jnp.float32)
    fuse = fuse + b2_ref[...].astype(jnp.float32)
    o_ref[...] = fuse.astype(o_ref.dtype)


def memory_gate(node_feature, vis_memory, sem_memory, w1, b1, w2, b2,
                *, tile_n=2048, vmem_limit_bytes=None, interpret=False):
    """Pallas MemoryGate forward.

    node_feature: [N, node_size], vis_memory: [N, vis_mem_size],
    sem_memory:   [N, sem_mem_size]
    w1: [D, D], b1: [D], w2: [D, out], b2: [out]   (D = node+vis+sem, [in,out])
    returns fuse: [N, out]
    """
    N, node_size = node_feature.shape
    vis_size = vis_memory.shape[1]
    sem_size = sem_memory.shape[1]
    D = node_size + vis_size + sem_size
    assert w1.shape == (D, D), (w1.shape, D)
    O = w2.shape[1]
    out_dtype = node_feature.dtype

    # Sublane granularity for the row tile: 8 (4B dtypes), 16 (2B), 32 (1B).
    sublane = {4: 8, 2: 16, 1: 32}[jnp.dtype(node_feature.dtype).itemsize]

    # Row tile: large (amortize per-step overhead) but clamped to ~ceil(N/2)
    # so there are >=2 grid steps whenever possible (v7x megacore sharding).
    # No input padding: Pallas masks the ragged last block (row-wise math,
    # OOB writes dropped), so the HBM streams are read/written exactly once.
    half = _round_up(max(1, -(-N // 2)), sublane)
    tile_n = max(sublane, min(_round_up(int(tile_n), sublane), half))
    grid = (pl.cdiv(N, tile_n),)

    # Pad the gate hidden dim up to a multiple of 128 lanes.  Zero padding is
    # exact: padded cat columns are 0, sigmoid(0)*0 == 0, and the padded rows
    # of W2 are zero, so they contribute nothing to the output.  Weights are
    # tiny and padded once outside the kernel.
    Dh = _round_up(D, 128)
    w1p = jnp.pad(w1, ((0, 0), (0, Dh - D)))
    b1p = jnp.pad(b1, (0, Dh - D)).reshape(1, Dh).astype(jnp.float32)
    w2p = jnp.pad(w2, ((0, Dh - D), (0, 0)))
    b2p = b2.reshape(1, O).astype(jnp.float32)

    out = pl.pallas_call(
        memory_gate_kernel,
        out_shape=jax.ShapeDtypeStruct((N, O), out_dtype),
        grid_spec=pltpu.PrefetchScalarGridSpec(
            num_scalar_prefetch=0,
            grid=grid,
            in_specs=[
                pl.BlockSpec((tile_n, node_size), lambda i: (i, 0)),  # xn rows
                pl.BlockSpec((tile_n, vis_size), lambda i: (i, 0)),   # xv rows
                pl.BlockSpec((tile_n, sem_size), lambda i: (i, 0)),   # xs rows
                pl.BlockSpec((D, Dh), lambda i: (0, 0)),              # W1 (resident)
                pl.BlockSpec((1, Dh), lambda i: (0, 0)),              # b1
                pl.BlockSpec((Dh, O), lambda i: (0, 0)),              # W2 (resident)
                pl.BlockSpec((1, O), lambda i: (0, 0)),               # b2
            ],
            out_specs=pl.BlockSpec((tile_n, O), lambda i: (i, 0)),
        ),
        compiler_params=pltpu.CompilerParams(
            dimension_semantics=("parallel",),
            vmem_limit_bytes=vmem_limit_bytes),
        interpret=interpret,
    )(node_feature, vis_memory, sem_memory, w1p, b1p, w2p, b2p)

    return out


def reference(node_feature, vis_memory, sem_memory, w1, b1, w2, b2):
    x = jnp.concatenate([node_feature, vis_memory, sem_memory], axis=1)
    cat = x @ w1 + b1
    gate = jax.nn.sigmoid(cat)
    return (gate * cat) @ w2 + b2


if __name__ == "__main__":
    # Small, MemoryGate-consistent sizes.
    vis_mem_size = 8
    sem_mem_size = 8
    node_size = 16
    out_size = 16
    D = vis_mem_size + sem_mem_size + node_size  # 32

    key = jax.random.PRNGKey(0)
    (k_node, k_vis, k_sem, k_w1, k_b1, k_w2, k_b2,
     k_node2, k_vis2, k_sem2) = jax.random.split(key, 10)

    # Parameters, stored as [in, out] (transpose of torch's [out, in]).
    lim = 1.0 / jnp.sqrt(D)
    w1 = jax.random.uniform(k_w1, (D, D), minval=-lim, maxval=lim, dtype=jnp.float32)
    b1 = jax.random.uniform(k_b1, (D,), minval=-lim, maxval=lim, dtype=jnp.float32)
    w2 = jax.random.uniform(k_w2, (D, out_size), minval=-lim, maxval=lim, dtype=jnp.float32)
    b2 = jax.random.uniform(k_b2, (out_size,), minval=-lim, maxval=lim, dtype=jnp.float32)

    # ---- Test 1: tiny batched fact graph (single tile) --------------------
    N = 8
    node_feature = jax.random.normal(k_node, (N, node_size), dtype=jnp.float32)
    vis_memory = jax.random.normal(k_vis, (N, vis_mem_size), dtype=jnp.float32)
    sem_memory = jax.random.normal(k_sem, (N, sem_mem_size), dtype=jnp.float32)

    fuse = memory_gate(node_feature, vis_memory, sem_memory, w1, b1, w2, b2)
    fuse = jax.block_until_ready(fuse)
    ref = reference(node_feature, vis_memory, sem_memory, w1, b1, w2, b2)
    assert fuse.shape == (N, out_size)
    assert jnp.allclose(fuse, ref, atol=1e-5, rtol=1e-5)

    # ---- Test 2: ragged node count, multi-tile pipelined grid -------------
    N2 = 100
    node2 = jax.random.normal(k_node2, (N2, node_size), dtype=jnp.float32)
    vis2 = jax.random.normal(k_vis2, (N2, vis_mem_size), dtype=jnp.float32)
    sem2 = jax.random.normal(k_sem2, (N2, sem_mem_size), dtype=jnp.float32)

    fuse2 = memory_gate(node2, vis2, sem2, w1, b1, w2, b2, tile_n=32)
    fuse2 = jax.block_until_ready(fuse2)
    ref2 = reference(node2, vis2, sem2, w1, b1, w2, b2)
    assert fuse2.shape == (N2, out_size)
    assert jnp.allclose(fuse2, ref2, atol=1e-5, rtol=1e-5)

    # ---- Test 3: default (large) tile path, N not a multiple of the tile --
    N3 = 300
    node3 = jax.random.normal(k_node, (N3, node_size), dtype=jnp.float32)
    vis3 = jax.random.normal(k_vis, (N3, vis_mem_size), dtype=jnp.float32)
    sem3 = jax.random.normal(k_sem, (N3, sem_mem_size), dtype=jnp.float32)

    fuse3 = memory_gate(node3, vis3, sem3, w1, b1, w2, b2)
    fuse3 = jax.block_until_ready(fuse3)
    ref3 = reference(node3, vis3, sem3, w1, b1, w2, b2)
    assert fuse3.shape == (N3, out_size)
    assert jnp.allclose(fuse3, ref3, atol=1e-5, rtol=1e-5)

    print("KERNEL_OK")
</pallas_src>

<mosaic_0001>
module attributes {stable_mosaic.version = 11 : i64} {
  func.func @memory_gate_kernel(%arg0: i32, %arg1: memref<8x16xf32, #tpu.memory_space<vmem>>, %arg2: memref<8x8xf32, #tpu.memory_space<vmem>>, %arg3: memref<8x8xf32, #tpu.memory_space<vmem>>, %arg4: memref<32x128xf32, #tpu.memory_space<vmem>>, %arg5: memref<1x128xf32, #tpu.memory_space<vmem>>, %arg6: memref<128x16xf32, #tpu.memory_space<vmem>>, %arg7: memref<1x16xf32, #tpu.memory_space<vmem>>, %arg8: memref<8x16xf32, #tpu.memory_space<vmem>>) attributes {dimension_semantics = [#tpu.dimension_semantics<parallel>], iteration_bounds = array<i64: 1>, scalar_prefetch = 0 : i64, scratch_operands = 0 : i64, tpu.core_type = #tpu.core_type<tc>, window_params = [{transform_indices = @transform_0, window_bounds = array<i64: 8, 16>}, {transform_indices = @transform_1, window_bounds = array<i64: 8, 8>}, {transform_indices = @transform_2, window_bounds = array<i64: 8, 8>}, {pipeline_mode = #tpu.pipeline_mode<synchronous>, transform_indices = @transform_3, window_bounds = array<i64: 32, 128>}, {pipeline_mode = #tpu.pipeline_mode<synchronous>, transform_indices = @transform_4, window_bounds = array<i64: 1, 128>}, {pipeline_mode = #tpu.pipeline_mode<synchronous>, transform_indices = @transform_5, window_bounds = array<i64: 128, 16>}, {pipeline_mode = #tpu.pipeline_mode<synchronous>, transform_indices = @transform_6, window_bounds = array<i64: 1, 16>}, {transform_indices = @transform_7, window_bounds = array<i64: 8, 16>}]} {
    %c0 = arith.constant 0 : index
    %c0_0 = arith.constant 0 : index
    %0 = vector.load %arg1[%c0, %c0_0] : memref<8x16xf32, #tpu.memory_space<vmem>>, vector<8x16xf32>
    %c0_1 = arith.constant 0 : index
    %c0_2 = arith.constant 0 : index
    %1 = vector.load %arg2[%c0_1, %c0_2] : memref<8x8xf32, #tpu.memory_space<vmem>>, vector<8x8xf32>
    %c0_3 = arith.constant 0 : index
    %c0_4 = arith.constant 0 : index
    %2 = vector.load %arg3[%c0_3, %c0_4] : memref<8x8xf32, #tpu.memory_space<vmem>>, vector<8x8xf32>
    %3 = tpu.concatenate %0, %1, %2 in 1 : vector<8x16xf32>, vector<8x8xf32>, vector<8x8xf32> -> vector<8x32xf32>
    %c0_5 = arith.constant 0 : index
    %c0_6 = arith.constant 0 : index
    %4 = vector.load %arg4[%c0_5, %c0_6] : memref<32x128xf32, #tpu.memory_space<vmem>>, vector<32x128xf32>
    %cst = arith.constant dense<0.000000e+00> : vector<8x128xf32>
    %5 = tpu.matmul %3, %4, %cst {dimension_numbers = #tpu.dot_dimension_numbers<[1], [0], [0], [1], [0, 0, 1, 1], [], []>} : vector<8x32xf32>, vector<32x128xf32>, vector<8x128xf32> -> vector<8x128xf32>
    %c0_7 = arith.constant 0 : index
    %c0_8 = arith.constant 0 : index
    %6 = vector.load %arg5[%c0_7, %c0_8] : memref<1x128xf32, #tpu.memory_space<vmem>>, vector<1x128xf32>
    %7 = vector.broadcast %6 : vector<1x128xf32> to vector<8x128xf32>
    %8 = arith.addf %5, %7 : vector<8x128xf32>
    %cst_9 = arith.constant 5.000000e-01 : f32
    %9 = vector.broadcast %cst_9 : f32 to vector<8x128xf32>
    %10 = arith.mulf %9, %8 : vector<8x128xf32>
    %11 = math.tanh %10 : vector<8x128xf32>
    %cst_10 = arith.constant 5.000000e-01 : f32
    %12 = vector.broadcast %cst_10 : f32 to vector<8x128xf32>
    %13 = arith.mulf %12, %11 : vector<8x128xf32>
    %cst_11 = arith.constant 5.000000e-01 : f32
    %14 = vector.broadcast %cst_11 : f32 to vector<8x128xf32>
    %15 = arith.addf %13, %14 : vector<8x128xf32>
    %16 = arith.mulf %15, %8 : vector<8x128xf32>
    %c0_12 = arith.constant 0 : index
    %c0_13 = arith.constant 0 : index
    %17 = vector.load %arg6[%c0_12, %c0_13] : memref<128x16xf32, #tpu.memory_space<vmem>>, vector<128x16xf32>
    %cst_14 = arith.constant dense<0.000000e+00> : vector<8x16xf32>
    %18 = tpu.matmul %16, %17, %cst_14 {dimension_numbers = #tpu.dot_dimension_numbers<[1], [0], [0], [1], [0, 0, 1, 1], [], []>} : vector<8x128xf32>, vector<128x16xf32>, vector<8x16xf32> -> vector<8x16xf32>
    %c0_15 = arith.constant 0 : index
    %c0_16 = arith.constant 0 : index
    %19 = vector.load %arg7[%c0_15, %c0_16] : memref<1x16xf32, #tpu.memory_space<vmem>>, vector<1x16xf32>
    %20 = vector.broadcast %19 : vector<1x16xf32> to vector<8x16xf32>
    %21 = arith.addf %18, %20 : vector<8x16xf32>
    %c0_17 = arith.constant 0 : index
    %c0_18 = arith.constant 0 : index
    %22 = vector.load %arg8[%c0_17, %c0_18] : memref<8x16xf32, #tpu.memory_space<vmem>>, vector<8x16xf32>
    tpu.vector_store %arg8[%c0_17, %c0_18], %21 {strides = array<i32>} : memref<8x16xf32, #tpu.memory_space<vmem>>, vector<8x16xf32>,
    return
  }
  func.func @transform_0(%arg0: i32) -> (i32, i32) {
    %c0_i32 = arith.constant 0 : i32
    %c0_i32_0 = arith.constant 0 : i32
    return %arg0, %c0_i32 : i32, i32
  }
  func.func @transform_1(%arg0: i32) -> (i32, i32) {
    %c0_i32 = arith.constant 0 : i32
    %c0_i32_0 = arith.constant 0 : i32
    return %arg0, %c0_i32 : i32, i32
  }
  func.func @transform_2(%arg0: i32) -> (i32, i32) {
    %c0_i32 = arith.constant 0 : i32
    %c0_i32_0 = arith.constant 0 : i32
    return %arg0, %c0_i32 : i32, i32
  }
  func.func @transform_3(%arg0: i32) -> (i32, i32) {
    %c0_i32 = arith.constant 0 : i32
    %c0_i32_0 = arith.constant 0 : i32
    %c0_i32_1 = arith.constant 0 : i32
    return %c0_i32, %c0_i32_0 : i32, i32
  }
  func.func @transform_4(%arg0: i32) -> (i32, i32) {
    %c0_i32 = arith.constant 0 : i32
    %c0_i32_0 = arith.constant 0 : i32
    %c0_i32_1 = arith.constant 0 : i32
    return %c0_i32, %c0_i32_0 : i32, i32
  }
  func.func @transform_5(%arg0: i32) -> (i32, i32) {
    %c0_i32 = arith.constant 0 : i32
    %c0_i32_0 = arith.constant 0 : i32
    %c0_i32_1 = arith.constant 0 : i32
    return %c0_i32, %c0_i32_0 : i32, i32
  }
  func.func @transform_6(%arg0: i32) -> (i32, i32) {
    %c0_i32 = arith.constant 0 : i32
    %c0_i32_0 = arith.constant 0 : i32
    %c0_i32_1 = arith.constant 0 : i32
    return %c0_i32, %c0_i32_0 : i32, i32
  }
  func.func @transform_7(%arg0: i32) -> (i32, i32) {
    %c0_i32 = arith.constant 0 : i32
    %c0_i32_0 = arith.constant 0 : i32
    return %arg0, %c0_i32 : i32, i32
  }
}

</mosaic_0001>

<bundles_post_ra>
// kernel: tpu_custom_call.1
= control target key start
LH: loop header
LB: loop body
LE: loop exit
PB: predicated region body
PF: predicated region fallthrough
CT: control target
= control target key end

     0   :  { %s170_s26 = smov 16   ;;  %s293_s0 = inlined_call_operand.vmem [shape: f32[8,16], index: 0, kind: input, shape index: {}]   ;;  %s294_s1 = inlined_call_operand.vmem [shape: f32[8,8], index: 1, kind: input, shape index: {}]   ;;  %s295_s2 = inlined_call_operand.vmem [shape: f32[8,8], index: 2, kind: input, shape index: {}]   ;;  %s296_s3 = inlined_call_operand.vmem [shape: f32[32,128], index: 3, kind: input, shape index: {}]   ;;  %s297_s4 = inlined_call_operand.vmem [shape: f32[1,128], index: 4, kind: input, shape index: {}]   ;;  %s298_s5 = inlined_call_operand.vmem [shape: f32[128,16], index: 5, kind: input, shape index: {}]   ;;  %s299_s6 = inlined_call_operand.vmem [shape: f32[1,16], index: 6, kind: input, shape index: {}]   ;;  %s300_s7 = inlined_call_operand.hbm [shape: f32[8,16], index: 7, kind: output, shape index: {}]  }
   0x1   :  { %v28_v0 = vld [vmem:[%s294_s1] sm:$0xff] }
   0x2   :  { %31 = vrot.lane.b32.xlu0 %v28_v0, %s170_s26 }
   0x3   :  { %12 = vsyncpa [#allocation3], 0  ;;  %v29_v1 = vld [vmem:[%s295_s2] sm:$0xff]  ;;  %s171_s29 = smov 24   ;;  %v45_v2 = vld [vmem:[%s296_s3 + $0x18] sm:$0xff]  ;;  %vm38_vm0 = vcmask 130048  }
   0x4   :  { %v44_v3 = vld [vmem:[%s296_s3 + $0x10] sm:$0xff]  ;;  %66 = vmatpush.msra.mxu0 %v45_v2  ;;  %v43_v4 = vld [vmem:[%s296_s3 + $0x8] sm:$0xff]  ;;  %v42_v5 = vld [vmem:[%s296_s3] sm:$0xff]  ;;  %vm40_vm1 = vcmask 195584   ;;  %vm50_vm2 = vcmask 261120   ;;  %s127_s26 = sshll.u32 %s300_s7, 4  ;;  %s128_s26 = int_to_ptr.hbm [resolvable:$true] %s127_s26 }
   0x5   :  { %v94_v6 = vld [vmem:[%s298_s5 + $0x78] sm:$0xff]  ;;  %v93_v7 = vld [vmem:[%s298_s5 + $0x70] sm:$0xff]  ;;  %v92_v8 = vld [vmem:[%s298_s5 + $0x68] sm:$0xff] }
   0x6   :  { %67 = vmatpush.msra.mxu0 %v44_v3  ;;  %99 = vmatpush.msra.mxu1 %v94_v6  ;;  %v91_v9 = vld [vmem:[%s298_s5 + $0x60] sm:$0xff]  ;;  %v90_v10 = vld [vmem:[%s298_s5 + $0x58] sm:$0xff]  ;;  %v89_v11 = vld [vmem:[%s298_s5 + $0x50] sm:$0xff] }
   0x7   :  { %v88_v12 = vld [vmem:[%s298_s5 + $0x48] sm:$0xff]  ;;  %v27_v14 = vld [vmem:[%s293_s0] sm:$0xff]  ;;  %v86_v19 = vld [vmem:[%s298_s5 + $0x38] sm:$0xff] }
   0x8   :  { %68 = vmatpush.msra.mxu0 %v43_v4  ;;  %100 = vmatpush.msra.mxu1 %v93_v7  ;;  %v87_v18 = vld [vmem:[%s298_s5 + $0x40] sm:$0xff]  ;;  %v85_v20 = vld [vmem:[%s298_s5 + $0x30] sm:$0xff]  ;;  %v84_v21 = vld [vmem:[%s298_s5 + $0x28] sm:$0xff] }
   0x9   :  { %v83_v22 = vld [vmem:[%s298_s5 + $0x20] sm:$0xff]  ;;  %v82_v23 = vld [vmem:[%s298_s5 + $0x18] sm:$0xff]  ;;  %v81_v24 = vld [vmem:[%s298_s5 + $0x10] sm:$0xff] }
   0xa   :  { %35 = vrot.lane.b32.xlu0 %v29_v1, %s171_s29  ;;  %69 = vmatpush.msra.mxu0 %v42_v5  ;;  %v80_v25 = vld [vmem:[%s298_s5 + $0x8] sm:$0xff]  ;;  %v79_v26 = vld [vmem:[%s298_s5] sm:$0xff]  ;;  %s172_s5 = smov [#allocation2]  }
   0xb   :  { %101 = vmatpush.msra.mxu1 %v92_v8  ;;  %v140_v27 = vld [vmem:[%s297_s4] ss:$0 sm:$0xff]  ;;  %s125_s23 = sshll.u32 %s172_s5, 4  ;;  %s126_s23 = int_to_ptr.vmem [resolvable:$true] %s125_s23 }
   0xc   :  { %v141_v35 = vld [vmem:[%s299_s6] ss:$0 sm:$0xff] }
   0xd   :  { %102 = vmatpush.msra.mxu1 %v91_v9 }
   0xf   :  { %103 = vmatpush.msra.mxu1 %v90_v10 }
  0x11   :  { %104 = vmatpush.msra.mxu1 %v89_v11 }
  0x13   :  { %105 = vmatpush.msra.mxu1 %v88_v12 }
  0x15   :  { %106 = vmatpush.msra.mxu1 %v87_v18 }
  0x17   :  { %107 = vmatpush.msra.mxu1 %v86_v19 }
  0x19   :  { %108 = vmatpush.msra.mxu1 %v85_v20 }
  0x1b   :  { %109 = vmatpush.msra.mxu1 %v84_v21 }
  0x1d   :  { %110 = vmatpush.msra.mxu1 %v83_v22 }
  0x1f   :  { %111 = vmatpush.msra.mxu1 %v82_v23 }
  0x21   :  { %112 = vmatpush.msra.mxu1 %v81_v24 }
  0x23   :  { %113 = vmatpush.msra.mxu1 %v80_v25 }
  0x25   :  { %114 = vmatpush.msra.mxu1 %v79_v26 }
  0x74   :  { %v32_v13 = vpop.permute.xlu0 %31 }
  0x75   :  { %v39_v15 = vsel %vm38_vm0, %v27_v14, %v32_v13 }
  0x7c   :  { %v36_v16 = vpop.permute.xlu0 %35 }
  0x7d   :  { %v41_v17 = vsel %vm40_vm1, %v39_v15, %v36_v16 }
  0x7e   :  { %136 = vmatmul.msk.f32.vlgmr.msra.gmra.mxu0 %vm50_vm2, %v41_v17 }
  0xfb   :  { %v71_v28 = vpop.f32.mrf.mxu0 }
  0xfc   :  { %v72_v29 = vadd.f32 %v140_v27, %v71_v28 }
  0xfe   :  { %v74_v30 = vmul.f32 0.5, %v72_v29 }
 0x100   :  { %142 = vtanh.f32 %v74_v30 }
 0x106   :  { %v143_v31 = vpop.eup %142 }
 0x107   :  { %v76_v32 = vmul.f32 0.5, %v143_v31 }
 0x109   :  { %v77_v33 = vadd.f32 0.5, %v76_v32 }
 0x10b   :  { %v78_v34 = vmul.f32 %v77_v33, %v72_v29 }
 0x10d   :  { %115 = vmatmul.f32.vlgmr.msra.gmra.mxu1 %v78_v34 }
 0x18a   :  { %v116_v36 = vpop.f32.mrf.mxu1 }
 0x18b   :  { %v117_v37 = vadd.f32 %v141_v35, %v116_v36 }
 0x18d   :  { %119 = vst.msk [vmem:[#allocation2] sm:$0xff] %vm38_vm0, %v117_v37 }
 0x18e   :  { %130 = dma.vmem_to_hbm [thread:$0]  %s126_s23, 128, %s128_s26, [#allocation3]  }
 0x18f   :  { %168 = dma.done.wait [#allocation3], 128  }
 0x190   :  { %169 = vsyncadd [#allocation3], 4294967168 }
 0x191   :  { %135 = vsyncpa [#allocation3], 1 }

</bundles_post_ra>
